<compile_context>
chip_gen: v6e
topology: v6e:2x2x1
jax: 0.10.0
libtpu: 0.0.40
codegen_flags: <defaults>
</compile_context>

<pallas_src>
import functools

import jax
import jax.numpy as jnp
from jax.experimental import pallas as pl
from jax.experimental.pallas import tpu as pltpu


def _partial_gram_kernel(fs_ref, ft_ref, gs_ref, gt_ref, *,
                         d, tile, tiles_per_split, needs_mask):
    """grid = (split, k).  split ('parallel') owns a chunk of the D reduction;
    k ('arbitrary') walks that chunk's (B, tile) feature slabs."""
    c = pl.program_id(0)
    k = pl.program_id(1)

    # Per-split partial Grams accumulate in the resident f32 output blocks.
    @pl.when(k == 0)
    def _init():
        gs_ref[...] = jnp.zeros_like(gs_ref)
        gt_ref[...] = jnp.zeros_like(gt_ref)

    fs = fs_ref[...]          # (B, tile), native dtype
    ft = ft_ref[...]

    if needs_mask:
        # Zero lanes past D.  Covers the ragged last tile (stale lanes beyond
        # the valid DMA region) and padded grid steps whose block index was
        # clamped by the index_map (rem <= 0 there -> fully masked).
        rem = d - (c * tiles_per_split + k) * tile
        mask = jax.lax.broadcasted_iota(jnp.int32, fs.shape, 1) < rem
        fs = jnp.where(mask, fs, jnp.zeros_like(fs))
        ft = jnp.where(mask, ft, jnp.zeros_like(ft))

    # Partial Grams on the MXU: G += f @ f.T (contract the feature axis of
    # both operands -> NT matmul, accumulate in f32).
    nt = (((1,), (1,)), ((), ()))
    gs_ref[0] = gs_ref[0] + jax.lax.dot_general(
        fs, fs, nt, preferred_element_type=jnp.float32)
    gt_ref[0] = gt_ref[0] + jax.lax.dot_general(
        ft, ft, nt, preferred_element_type=jnp.float32)


def _round_up(x, m):
    return (x + m - 1) // m * m


def _vmem_capacity_bytes():
    try:
        return int(pltpu.get_tpu_info().vmem_capacity_bytes)
    except Exception:
        return 64 * 1024 * 1024  # conservative fallback (v7x per-TC VMEM)


def batch_sim_loss(featmap_src, featmap_tgt, *, normalize=True,
                   tile_d=None, num_splits=2):
    """JAX/Pallas equivalent of BatchSimLoss.forward (normalize=True path).

    featmap_src, featmap_tgt: [B, C, H, W] (NCHW, matching PyTorch).
    tile_d:     feature-axis tile (lanes).  None -> derived from VMEM budget.
    num_splits: parallel shards of the D reduction (2 uses both v7x TCs;
                harmless on 1-TC chips).
    """
    if not normalize:
        # TODO(synk): normalize=False path uses F.binary_cross_entropy on the
        # raw Gram matrices; not implemented here.
        raise NotImplementedError("normalize=False (BCE) path not implemented")

    B = featmap_src.shape[0]
    f_src = featmap_src.reshape(B, -1)    # free reshape, no HBM copy
    f_tgt = featmap_tgt.reshape(B, -1)
    D = f_src.shape[1]
    itemsize = jnp.dtype(f_src.dtype).itemsize

    # ---- tile sizing from a per-generation VMEM budget ----------------------
    cap = _vmem_capacity_bytes()          # 64 MiB (v7x) / 128 MiB (v5e, v6e)
    # 2 inputs x 2 pipeline buffers of (B, tile); keep them to ~half of VMEM.
    blocks_budget = max(8 * 1024 * 1024, cap // 2 - 4 * 1024 * 1024)
    # Physical VMEM rows per block are sublane-rounded (>= 8 rows per tile).
    phys_rows = _round_up(max(B, 1), 8)
    if tile_d is None:
        tile = blocks_budget // (4 * phys_rows * itemsize)
    else:
        tile = tile_d
    tile = min(tile, _round_up(D, 128))
    tile = max(128, (tile // 128) * 128)  # 128-lane aligned

    total_tiles = (D + tile - 1) // tile
    nsplit = max(1, min(num_splits, total_tiles))
    tiles_per_split = (total_tiles + nsplit - 1) // nsplit
    # Mask needed if the grid covers more lanes than D (ragged tail and/or
    # padded steps created by the split).
    needs_mask = (nsplit * tiles_per_split * tile != D)

    block_bytes = phys_rows * tile * itemsize
    vmem_limit = min(int(cap * 0.75),
                     max(16 * 1024 * 1024, 4 * block_bytes + 4 * 1024 * 1024))

    # Advisory cost for XLA scheduling: two Grams of 2*B*B*D flops each.
    cost = pl.CostEstimate(
        flops=4 * B * B * D,
        transcendentals=0,
        bytes_accessed=2 * B * D * itemsize + 2 * nsplit * B * B * 4,
    )

    def in_map(c, k):
        # Clamp so padded grid steps stay in bounds; their contribution is
        # zero-masked in the kernel.
        return (0, jnp.minimum(c * tiles_per_split + k, total_tiles - 1))

    kernel = functools.partial(
        _partial_gram_kernel, d=D, tile=tile,
        tiles_per_split=tiles_per_split, needs_mask=needs_mask)

    gram_shape = jax.ShapeDtypeStruct((nsplit, B, B), jnp.float32)
    gs, gt = pl.pallas_call(
        kernel,
        out_shape=(gram_shape, gram_shape),
        grid_spec=pltpu.PrefetchScalarGridSpec(
            num_scalar_prefetch=0,
            grid=(nsplit, tiles_per_split),
            in_specs=[
                pl.BlockSpec((B, tile), in_map),
                pl.BlockSpec((B, tile), in_map),
            ],
            out_specs=(
                pl.BlockSpec((1, B, B), lambda c, k: (c, 0, 0)),
                pl.BlockSpec((1, B, B), lambda c, k: (c, 0, 0)),
            ),
        ),
        compiler_params=pltpu.CompilerParams(
            dimension_semantics=("parallel", "arbitrary"),
            vmem_limit_bytes=vmem_limit,
        ),
        cost_estimate=cost,
    )(f_src, f_tgt)

    # ---- O(B^2) finalize in plain JAX ---------------------------------------
    a_s = jnp.sum(gs, axis=0)
    a_t = jnp.sum(gt, axis=0)
    # F.normalize(A, p=2, dim=1): rows scaled by 1 / max(||row||_2, eps).
    # rsqrt(max(sumsq, eps^2)) == 1 / max(sqrt(sumsq), eps).
    eps2 = jnp.float32(1e-24)
    inv_s = jax.lax.rsqrt(
        jnp.maximum(jnp.sum(a_s * a_s, axis=1, keepdims=True), eps2))
    inv_t = jax.lax.rsqrt(
        jnp.maximum(jnp.sum(a_t * a_t, axis=1, keepdims=True), eps2))
    diff = a_s * inv_s - a_t * inv_t
    return jnp.sum(diff * diff) / jnp.float32(B)


def _reference_loss(featmap_src, featmap_tgt):
    """Plain-JAX reference mirroring the PyTorch module exactly."""
    B = featmap_src.shape[0]
    fs = featmap_src.reshape(B, -1).astype(jnp.float32)
    ft = featmap_tgt.reshape(B, -1).astype(jnp.float32)
    hi = jax.lax.Precision.HIGHEST
    a_s = jnp.dot(fs, fs.T, precision=hi)
    a_t = jnp.dot(ft, ft.T, precision=hi)
    eps = 1e-12
    a_s = a_s / jnp.maximum(jnp.linalg.norm(a_s, axis=1, keepdims=True), eps)
    a_t = a_t / jnp.maximum(jnp.linalg.norm(a_t, axis=1, keepdims=True), eps)
    return jnp.sum((a_s - a_t) ** 2) / B


if __name__ == "__main__":
    key = jax.random.PRNGKey(0)
    k1, k2, k3, k4 = jax.random.split(key, 4)

    # Case 1: small explicit tile so each split runs several grid steps ->
    # exercises accumulation, ragged-tail masking and the clamped (padded)
    # grid steps of the 2-way core split.
    B, C, H, W = 2, 4, 16, 16                       # D = 1024
    src1 = jax.random.normal(k1, (B, C, H, W), dtype=jnp.float32)
    tgt1 = jax.random.normal(k2, (B, C, H, W), dtype=jnp.float32)
    out1 = jax.block_until_ready(
        batch_sim_loss(src1, tgt1, tile_d=384, num_splits=2))
    ref1 = jax.block_until_ready(_reference_loss(src1, tgt1))
    assert jnp.isfinite(out1), out1
    assert jnp.allclose(out1, ref1, rtol=1e-4, atol=1e-6), (out1, ref1)

    # Case 2: same inputs, default VMEM-budget-derived tile.
    out2 = jax.block_until_ready(batch_sim_loss(src1, tgt1))
    assert jnp.allclose(out2, ref1, rtol=1e-4, atol=1e-6), (out2, ref1)

    # Case 3: odd batch and D not a multiple of 128 -> ragged tail handled
    # entirely in-kernel (no wrapper padding anywhere).
    B, C, H, W = 3, 3, 10, 10                       # D = 300
    src3 = jax.random.normal(k3, (B, C, H, W), dtype=jnp.float32)
    tgt3 = jax.random.normal(k4, (B, C, H, W), dtype=jnp.float32)
    out3 = jax.block_until_ready(batch_sim_loss(src3, tgt3))
    ref3 = jax.block_until_ready(_reference_loss(src3, tgt3))
    assert jnp.allclose(out3, ref3, rtol=1e-4, atol=1e-6), (out3, ref3)

    print("KERNEL_OK")
</pallas_src>

<mosaic_0001>
module attributes {stable_mosaic.version = 11 : i64} {
  func.func @_partial_gram_kernel(%arg0: i32, %arg1: i32, %arg2: memref<2x384xf32, #tpu.memory_space<vmem>>, %arg3: memref<2x384xf32, #tpu.memory_space<vmem>>, %arg4: memref<1x2x2xf32, #tpu.memory_space<vmem>>, %arg5: memref<1x2x2xf32, #tpu.memory_space<vmem>>) attributes {dimension_semantics = [#tpu.dimension_semantics<parallel>, #tpu.dimension_semantics<arbitrary>], iteration_bounds = array<i64: 2, 2>, scalar_prefetch = 0 : i64, scratch_operands = 0 : i64, tpu.core_type = #tpu.core_type<tc>, window_params = [{transform_indices = @transform_0, window_bounds = array<i64: 2, 384>}, {transform_indices = @transform_1, window_bounds = array<i64: 2, 384>}, {transform_indices = @transform_2, window_bounds = array<i64: 1, 2, 2>}, {transform_indices = @transform_3, window_bounds = array<i64: 1, 2, 2>}]} {
    %c0_i32 = arith.constant 0 : i32
    %0 = arith.cmpi eq, %arg1, %c0_i32 : i32
    %1 = arith.extui %0 : i1 to i32
    %c0_i32_0 = arith.constant 0 : i32
    %2 = arith.cmpi ne, %1, %c0_i32_0 : i32
    scf.if %2 {
      %cst_19 = arith.constant 0.000000e+00 : f32
      %30 = vector.broadcast %cst_19 : f32 to vector<1x2x2xf32>
      %c0_20 = arith.constant 0 : index
      %c0_21 = arith.constant 0 : index
      %c0_22 = arith.constant 0 : index
      %31 = vector.load %arg4[%c0_20, %c0_21, %c0_22] : memref<1x2x2xf32, #tpu.memory_space<vmem>>, vector<1x2x2xf32>
      tpu.vector_store %arg4[%c0_20, %c0_21, %c0_22], %30 {strides = array<i32>} : memref<1x2x2xf32, #tpu.memory_space<vmem>>, vector<1x2x2xf32>,
      %cst_23 = arith.constant 0.000000e+00 : f32
      %32 = vector.broadcast %cst_23 : f32 to vector<1x2x2xf32>
      %c0_24 = arith.constant 0 : index
      %c0_25 = arith.constant 0 : index
      %c0_26 = arith.constant 0 : index
      %33 = vector.load %arg5[%c0_24, %c0_25, %c0_26] : memref<1x2x2xf32, #tpu.memory_space<vmem>>, vector<1x2x2xf32>
      tpu.vector_store %arg5[%c0_24, %c0_25, %c0_26], %32 {strides = array<i32>} : memref<1x2x2xf32, #tpu.memory_space<vmem>>, vector<1x2x2xf32>,
    } else {
    }
    %c0 = arith.constant 0 : index
    %c0_1 = arith.constant 0 : index
    %3 = vector.load %arg2[%c0, %c0_1] : memref<2x384xf32, #tpu.memory_space<vmem>>, vector<2x384xf32>
    %c0_2 = arith.constant 0 : index
    %c0_3 = arith.constant 0 : index
    %4 = vector.load %arg3[%c0_2, %c0_3] : memref<2x384xf32, #tpu.memory_space<vmem>>, vector<2x384xf32>
    %c2_i32 = arith.constant 2 : i32
    %5 = arith.muli %arg0, %c2_i32 : i32
    %6 = arith.addi %5, %arg1 : i32
    %c384_i32 = arith.constant 384 : i32
    %7 = arith.muli %6, %c384_i32 : i32
    %c1024_i32 = arith.constant 1024 : i32
    %8 = arith.subi %c1024_i32, %7 : i32
    %9 = tpu.iota {dimensions = array<i32: 1>} : vector<2x384xi32>
    %10 = vector.broadcast %8 : i32 to vector<2x384xi32>
    %11 = arith.cmpi slt, %9, %10 : vector<2x384xi32>
    %cst = arith.constant 0.000000e+00 : f32
    %12 = vector.broadcast %cst : f32 to vector<2x384xf32>
    %13 = arith.select %11, %3, %12 : vector<2x384xi1>, vector<2x384xf32>
    %cst_4 = arith.constant 0.000000e+00 : f32
    %14 = vector.broadcast %cst_4 : f32 to vector<2x384xf32>
    %15 = arith.select %11, %4, %14 : vector<2x384xi1>, vector<2x384xf32>
    %c0_5 = arith.constant 0 : index
    %c0_6 = arith.constant 0 : index
    %c0_7 = arith.constant 0 : index
    %16 = vector.load %arg4[%c0_5, %c0_6, %c0_7] : memref<1x2x2xf32, #tpu.memory_space<vmem>>, vector<1x2x2xf32>
    %17 = vector.shape_cast %16 : vector<1x2x2xf32> to vector<2x2xf32>
    %cst_8 = arith.constant dense<0.000000e+00> : vector<2x2xf32>
    %18 = tpu.matmul %13, %13, %cst_8 {dimension_numbers = #tpu.dot_dimension_numbers<[1], [1], [0], [0], [0, 0, 1, 0], [], []>} : vector<2x384xf32>, vector<2x384xf32>, vector<2x2xf32> -> vector<2x2xf32>
    %19 = arith.addf %17, %18 : vector<2x2xf32>
    %c0_9 = arith.constant 0 : index
    %c0_10 = arith.constant 0 : index
    %c0_11 = arith.constant 0 : index
    %20 = vector.load %arg4[%c0_9, %c0_10, %c0_11] : memref<1x2x2xf32, #tpu.memory_space<vmem>>, vector<1x2x2xf32>
    %21 = vector.shape_cast %20 : vector<1x2x2xf32> to vector<2x2xf32>
    %22 = vector.shape_cast %19 : vector<2x2xf32> to vector<1x2x2xf32>
    tpu.vector_store %arg4[%c0_9, %c0_10, %c0_11], %22 {strides = array<i32>} : memref<1x2x2xf32, #tpu.memory_space<vmem>>, vector<1x2x2xf32>,
    %c0_12 = arith.constant 0 : index
    %c0_13 = arith.constant 0 : index
    %c0_14 = arith.constant 0 : index
    %23 = vector.load %arg5[%c0_12, %c0_13, %c0_14] : memref<1x2x2xf32, #tpu.memory_space<vmem>>, vector<1x2x2xf32>
    %24 = vector.shape_cast %23 : vector<1x2x2xf32> to vector<2x2xf32>
    %cst_15 = arith.constant dense<0.000000e+00> : vector<2x2xf32>
    %25 = tpu.matmul %15, %15, %cst_15 {dimension_numbers = #tpu.dot_dimension_numbers<[1], [1], [0], [0], [0, 0, 1, 0], [], []>} : vector<2x384xf32>, vector<2x384xf32>, vector<2x2xf32> -> vector<2x2xf32>
    %26 = arith.addf %24, %25 : vector<2x2xf32>
    %c0_16 = arith.constant 0 : index
    %c0_17 = arith.constant 0 : index
    %c0_18 = arith.constant 0 : index
    %27 = vector.load %arg5[%c0_16, %c0_17, %c0_18] : memref<1x2x2xf32, #tpu.memory_space<vmem>>, vector<1x2x2xf32>
    %28 = vector.shape_cast %27 : vector<1x2x2xf32> to vector<2x2xf32>
    %29 = vector.shape_cast %26 : vector<2x2xf32> to vector<1x2x2xf32>
    tpu.vector_store %arg5[%c0_16, %c0_17, %c0_18], %29 {strides = array<i32>} : memref<1x2x2xf32, #tpu.memory_space<vmem>>, vector<1x2x2xf32>,
    return
  }
  func.func @transform_0(%arg0: i32, %arg1: i32) -> (i32, i32) {
    %c2_i32 = arith.constant 2 : i32
    %0 = arith.muli %arg0, %c2_i32 : i32
    %1 = arith.addi %0, %arg1 : i32
    %c2_i32_0 = arith.constant 2 : i32
    %2 = arith.minsi %1, %c2_i32_0 : i32
    %c0_i32 = arith.constant 0 : i32
    %c0_i32_1 = arith.constant 0 : i32
    return %c0_i32, %2 : i32, i32
  }
  func.func @transform_1(%arg0: i32, %arg1: i32) -> (i32, i32) {
    %c2_i32 = arith.constant 2 : i32
    %0 = arith.muli %arg0, %c2_i32 : i32
    %1 = arith.addi %0, %arg1 : i32
    %c2_i32_0 = arith.constant 2 : i32
    %2 = arith.minsi %1, %c2_i32_0 : i32
    %c0_i32 = arith.constant 0 : i32
    %c0_i32_1 = arith.constant 0 : i32
    return %c0_i32, %2 : i32, i32
  }
  func.func @transform_2(%arg0: i32, %arg1: i32) -> (i32, i32, i32) {
    %c0_i32 = arith.constant 0 : i32
    %c0_i32_0 = arith.constant 0 : i32
    %c0_i32_1 = arith.constant 0 : i32
    return %arg0, %c0_i32, %c0_i32_0 : i32, i32, i32
  }
  func.func @transform_3(%arg0: i32, %arg1: i32) -> (i32, i32, i32) {
    %c0_i32 = arith.constant 0 : i32
    %c0_i32_0 = arith.constant 0 : i32
    %c0_i32_1 = arith.constant 0 : i32
    return %arg0, %c0_i32, %c0_i32_0 : i32, i32, i32
  }
}

</mosaic_0001>

<bundles_post_ra>
// kernel: tpu_custom_call.1
= control target key start
LH: loop header
LB: loop body
LE: loop exit
PB: predicated region body
PF: predicated region fallthrough
CT: control target
= control target key end

     0   :  { %9 = vsyncpa [#allocation3], 0  ;;  %s1529_s0 = inlined_call_operand.hbm [shape: f32[2,1024], index: 0, kind: input, shape index: {}]   ;;  %s1530_s1 = inlined_call_operand.hbm [shape: f32[2,1024], index: 1, kind: input, shape index: {}]   ;;  %s1531_s2 = inlined_call_operand.hbm [shape: f32[2,2,2], index: 2, kind: output, shape index: {0}]   ;;  %s1532_s3 = inlined_call_operand.hbm [shape: f32[2,2,2], index: 3, kind: output, shape index: {1}]  }
   0x1   :  { %11 = vsyncpa [#allocation3 + $0x1], 0 }
   0x2   :  { %12 = vsyncpa [#allocation6], 0 }
   0x3   :  { %14 = vsyncpa [#allocation6 + $0x1], 0 }
   0x4   :  { %15 = vsyncpa [#allocation4], 0 }
   0x5   :  { %17 = vsyncpa [#allocation4 + $0x1], 0 }
   0x6   :  { %18 = vsyncpa [#allocation9], 0 }
   0x7   :  { %20 = vsyncpa [#allocation9 + $0x1], 0  ;;  %s1230_s12 = smov 0   ;;  %s1232_s13 = smov 0  }
   0x8   :  { %s1234_s14 = smov 0   ;;  %s1236_s15 = smov 0  }
   0x9   :  { %s1238_s16 = smov 0   ;;  %s1240_s17 = smov 0  }
   0xa   :  { %s1242_s18 = smov 0   ;;  %s1244_s19 = smov 0  }
   0xb   :  { %s1246_s20 = smov 0   ;;  %s1248_s21 = smov 0  }
   0xc   :  { %s1250_s22 = smov 0  }
   0xd LB: > { %1537 = sst [smem:[#allocation14_spill]] %s1192_s20  ;;  %s824_s23 = sadd.s32 4294967295, %s1200_s22   ;;  %s1200_s22 = sphi %s1250_s22, %s26_s22   ;;  %s1196_s21 = sphi %s1248_s21, %s1549_s21   ;;  %s1192_s20 = sphi %s1246_s20, %s1548_s20   ;;  %s1188_s19 = sphi %s1244_s19, %s1547_s19   ;;  %s1184_s18 = sphi %s1242_s18, %s1546_s18   ;;  %s1180_s17 = sphi %s1240_s17, %s1555_s17   ;;  %s1176_s16 = sphi %s1238_s16, %s1554_s16   ;;  %s1172_s15 = sphi %s1236_s15, %s1553_s15   ;;  %s1168_s14 = sphi %s1234_s14, %s1552_s14   ;;  %s1164_s13 = sphi %s1232_s13, %s1551_s13   ;;  %s1160_s12 = sphi %s1230_s12, %s1550_s12  }
   0xe   : > { %1538 = sst [smem:[#allocation15_spill]] %s1196_s21  ;;  %s825_s24 = sadd.s32 4294967294, %s1200_s22  }
   0xf   : > { %s35_s25 = sadd.s32 1, %s1192_s20  ;;  %s38_s26 = sadd.s32 1, %s1196_s21 }
  0x10   : > { %p36_p0 = scmp.ge.s32.totalorder %s35_s25, 2  ;;  %s826_s27 = sshll.u32 %s1196_s21, 1 }
  0x11   : > { %s43_s28 = sadd.s32 %s1192_s20, %s826_s27  ;;  %s53_s29 = sadd.s32 1, %s1180_s17 }
  0x12   : > { %s1557_s25 = smov (%p36_p0, %s35_s25), 0  ;;  %s1559_s26 = smov (!%p36_p0, %s38_s26), %s1196_s21 }
  0x13   : > { %1539 = sst [smem:[#allocation16_spill]] %s1557_s25  ;;  %p44_p1 = scmp.lt.s32.totalorder %s43_s28, 2 }
  0x14   : > { %p60_p2 = scmp.ne.s32.totalorder %s1180_s17, %s1176_s16  ;;  %p40_p3 = scmp.ge.s32.totalorder %s1559_s26, 2 }
  0x15   : > { %p61_p4 = scmp.eq.s32.totalorder %s1200_s22, 0  ;;  %s1561_s28 = smov (!%p44_p1, %s43_s28), 2 }
  0x16   : > { %s1563_s26 = smov (%p40_p3, %s1559_s26), 0  ;;  %p66_p6 = scmp.ne.s32.totalorder %s1176_s16, %s1172_s15 }
  0x17   : > { %1540 = sst [smem:[#allocation17_spill]] %s1563_s26  ;;  %p1302_p5 = por %p61_p4, %p60_p2 }
  0x18   : > { %s827_s4 = sshll.u32 %s1563_s26, 1  ;;  %p67_p7 = scmp.eq.s32.totalorder %s824_s23, 0 }
  0x19   : > { %s47_s5 = sadd.s32 %s827_s4, %s1557_s25  ;;  %s110_s6 = ssub.s32 %s1196_s21, %s1563_s26 }
  0x1a   : > { %p48_p8 = scmp.lt.s32.totalorder %s47_s5, 2  ;;  %p1314_p9 = por %p67_p7, %p66_p6 }
  0x1b   : > { %p111_p10 = scmp.eq.s32.totalorder %s110_s6, 0  ;;  %s113_s8 = sadd.s32 1, %s1168_s14 }
  0x1c   : > { %s1565_s5 = smov (!%p48_p8, %s47_s5), 2  ;;  %p123_p11 = scmp.ne.s32.totalorder %s1168_s14, %s1164_s13 }
  0x1d   : > { %s1320_s9 = scalar_select %p111_p10, %s1168_s14, %s113_s8  }
  0x1e   : > { %s50_s10 = ssub.s32 %s1561_s28, %s1565_s5  ;;  %p124_p13 = scmp.eq.s32.totalorder %s824_s23, 3 }
  0x1f   : > { %p51_p12 = scmp.eq.s32.totalorder %s50_s10, 0  ;;  %p129_p0 = scmp.ne.s32.totalorder %s1164_s13, %s1160_s12 }
  0x20   : > { %p130_p1 = scmp.eq.s32.totalorder %s825_s24, 3  ;;  %p1334_p2 = por %p124_p13, %p123_p11 }
  0x21   : > { %s1332_s11 = scalar_select %p51_p12, %s1180_s17, %s53_s29  }
  0x22   : > { %p1338_p3 = por %p130_p1, %p129_p0  ;;  %p831_p4 = scmp.ge.s32.totalorder %s1200_s22, 4 }
  0x24   : > { %s1544_s27 = scalar_select %p1338_p3, 1, 0 }
  0x25   : > { %172 = sbr.rel (%p831_p4) target bundleno = 108 (0x6c), region = 16 }
  0x2a   : > { %175 = sbr.rel (!%p1302_p5) target bundleno = 75 (0x4b), region = 20  ;;  %s176_s23 = sand.u32 (%p1302_p5), 1, %s1180_s17  }
  0x2b   : > { %s185_s24 = smul.u32 (%p1302_p5), 3, %s1561_s28  ;;  %s1350_s8 = scalar_lea.sflag (%p1302_p5), [#allocation3], %s176_s23 }
  0x2c   : > { %s883_s29 = smul.u32 (%p1302_p5), 6, %s176_s23 }
  0x2d   : > { %s186_s4 = ssub.s32 (%p1302_p5), 8, %s185_s24 }
  0x2e   : > { %p187_p6 = scmp.lt.s32.totalorder (%p1302_p5), %s186_s4, 3  ;;  %s180_s10 = scalar_lea.vmem (%p1302_p5), [#allocation2], %s883_s29 }
  0x30   : > { %s1567_s4 = smov (!%p187_p6, %s186_s4), 3 }
  0x31   : > { %s1347_s5 = sshll.u32 %s1567_s4, 5 }
  0x32   : > { %s191_s6 = ssub.s32 96, %s1347_s5 }
  0x33   : > { %192 = vsyncadd %s1350_s8, %s191_s6  ;;  %p834_p7 = scmp.ne.s32.totalorder %s1347_s5, 0  ;;  %s867_s26 = smul.u32 96, %s1561_s28 }
  0x34   : > { %s198_s25 = sshll.u32 %s180_s10, 4  ;;  %s998_s6 = scalar_lea.hbm %s1529_s0, 256  ;;  %s199_s25 = int_to_ptr.vmem [resolvable:$true] %s198_s25 }
  0x35   : > { %s195_s20 = scalar_lea.hbm %s1529_s0, %s867_s26 }
  0x36   : > { %s994_s4 = scalar_lea.hbm %s195_s20, %s1347_s5 }
  0x37   : > { %p995_p8 = scmp.ne.s32.totalorder %s195_s20, %s994_s4  ;;  %p1000_p12 = scmp.lt.s32.totalorder %s998_s6, %s994_s4 }
  0x39   : > { %p996_p10 = pnand %p995_p8, %p834_p7 }
  0x3b   : > { %p997_p11 = pneg %p996_p10 }
  0x3d   : > { %p1002_p13 = pnand %p1000_p12, %p997_p11 }
  0x3f   : > { %1005 = shalt.err (!%p1002_p13)
}
  0x40   : > { %s1006_s10 = scalar_lea.vmem %s199_s25, %s1347_s5  ;;  %s1202_s21 = smov [#allocation2]  }
  0x41   : > { %p1007_p0 = scmp.ne.s32.totalorder %s199_s25, %s1006_s10  ;;  %s1010_s26 = sshll.u32 %s1202_s21, 4  ;;  %s1011_s26 = int_to_ptr.vmem [resolvable:$false] %s1010_s26 }
  0x42   : > { %s1012_s24 = scalar_lea.vmem %s1011_s26, 192  ;;  %p1013_p6 = scmp.lt.s32.totalorder %s199_s25, %s1011_s26 }
  0x43   : > { %p1008_p1 = pnand %p1007_p0, %p834_p7  ;;  %p1014_p8 = scmp.lt.s32.totalorder %s1012_s24, %s1006_s10 }
  0x45   : > { %p1009_p4 = pneg %p1008_p1  ;;  %p1015_p10 = por %p1014_p8, %p1013_p6 }
  0x47   : > { %p1016_p3 = pnand %p1015_p10, %p1009_p4 }
  0x49   : > { %1019 = shalt.err (!%p1016_p3)
}
  0x4a   : > { %201 = dma.hbm_to_vmem [thread:$0]  (%p834_p7), %s195_s20, %s1347_s5, %s199_s25, %s1350_s8  }
  0x4b PF: > { %204 = sbr.rel (!%p1302_p5) target bundleno = 108 (0x6c), region = 24  ;;  %s205_s4 = sand.u32 (%p1302_p5), 1, %s1180_s17  }
  0x4c   : > { %s214_s23 = smul.u32 (%p1302_p5), 3, %s1561_s28  ;;  %s1378_s26 = scalar_lea.sflag (%p1302_p5), [#allocation6], %s205_s4 }
  0x4d   : > { %s884_s29 = smul.u32 (%p1302_p5), 6, %s205_s4 }
  0x4e   : > { %s215_s6 = ssub.s32 (%p1302_p5), 8, %s214_s23 }
  0x4f   : > { %p216_p11 = scmp.lt.s32.totalorder (%p1302_p5), %s215_s6, 3  ;;  %s209_s20 = scalar_lea.vmem (%p1302_p5), [#allocation5], %s884_s29 }
  0x51   : > { %s1569_s6 = smov (!%p216_p11, %s215_s6), 3 }
  0x52   : > { %s1375_s10 = sshll.u32 %s1569_s6, 5 }
  0x53   : > { %s220_s21 = ssub.s32 96, %s1375_s10 }
  0x54   : > { %221 = vsyncadd %s1378_s26, %s220_s21  ;;  %p840_p5 = scmp.ne.s32.totalorder %s1375_s10, 0  ;;  %s868_s25 = smul.u32 96, %s1561_s28 }
  0x55   : > { %s227_s30 = sshll.u32 %s209_s20, 4  ;;  %s1024_s6 = scalar_lea.hbm %s1530_s1, 256  ;;  %s228_s30 = int_to_ptr.vmem [resolvable:$true] %s227_s30 }
  0x56   : > { %s224_s24 = scalar_lea.hbm %s1530_s1, %s868_s25 }
  0x57   : > { %s1020_s23 = scalar_lea.hbm %s224_s24, %s1375_s10 }
  0x58   : > { %p1021_p3 = scmp.ne.s32.totalorder %s224_s24, %s1020_s23  ;;  %p1026_p13 = scmp.lt.s32.totalorder %s1024_s6, %s1020_s23 }
  0x5a   : > { %p1022_p7 = pnand %p1021_p3, %p840_p5 }
  0x5c   : > { %p1023_p12 = pneg %p1022_p7 }
  0x5e   : > { %p1028_p0 = pnand %p1026_p13, %p1023_p12 }
  0x60   : > { %1031 = shalt.err (!%p1028_p0)
}
  0x61   : > { %s1032_s28 = scalar_lea.vmem %s228_s30, %s1375_s10  ;;  %s1203_s21 = smov [#allocation5]  }
  0x62   : > { %p1033_p1 = scmp.ne.s32.totalorder %s228_s30, %s1032_s28  ;;  %s1036_s20 = sshll.u32 %s1203_s21, 4  ;;  %s1037_s20 = int_to_ptr.vmem [resolvable:$false] %s1036_s20 }
  0x63   : > { %s1038_s25 = scalar_lea.vmem %s1037_s20, 192  ;;  %p1039_p8 = scmp.lt.s32.totalorder %s228_s30, %s1037_s20 }
  0x64   : > { %p1034_p4 = pnand %p1033_p1, %p840_p5  ;;  %p1040_p10 = scmp.lt.s32.totalorder %s1038_s25, %s1032_s28 }
  0x66   : > { %p1035_p6 = pneg %p1034_p4  ;;  %p1041_p11 = por %p1040_p10, %p1039_p8 }
  0x68   : > { %p1042_p3 = pnand %p1041_p11, %p1035_p6 }
  0x6a   : > { %1045 = shalt.err (!%p1042_p3)
}
  0x6b   : > { %230 = dma.hbm_to_vmem [thread:$0]  (%p840_p5), %s224_s24, %s1375_s10, %s228_s30, %s1378_s26  }
  0x6c PF: > { %p844_p7 = scmp.ge.s32.totalorder %s1200_s22, 1  ;;  %p232_p12 = scmp.lt.s32.totalorder %s1200_s22, 5 }
  0x6e   : > { %p233_p13 = pnand %p844_p7, %p232_p12 }
  0x6f   : > { %s238_s5 = sand.u32 (!%p233_p13), 1, %s1176_s16  }
  0x70   : > { %236 = sbr.rel (%p233_p13) target bundleno = 378 (0x17a), region = 28  ;;  %s239_s23 = scalar_lea.sflag (!%p233_p13), [#allocation3], %s238_s5 }
  0x71   : > { %s885_s8 = smul.u32 (!%p233_p13), 6, %s238_s5 }
  0x73   : > { %s242_s4 = scalar_lea.vmem (!%p233_p13), [#allocation2], %s885_s8 }
  0x75   : > { %1143 = dma.done.wait (%p1314_p9), %s239_s23, 96  }
  0x76   : > { %1145 = vsyncadd (%p1314_p9), %s239_s23, 4294967200  ;;  %s248_s10 = scalar_lea.sflag [#allocation6], %s238_s5  ;;  %s251_s26 = scalar_lea.vmem [#allocation5], %s885_s8 }
  0x77   : > { %1147 = dma.done.wait (%p1314_p9), %s248_s10, 96  }
  0x78   : > { %1149 = vsyncadd (%p1314_p9), %s248_s10, 4294967200  ;;  %s1411_s30 = sand.u32 1, %s1164_s13   ;;  %p847_p5 = scmp.ne.s32.totalorder %s1184_s18, 0 }
  0x79   : > { %s845_s24 = sshll.u32 %s1411_s30, 1 }
  0x7a   : > { %s1414_s29 = scalar_lea.vmem [#allocation7], %s845_s24  ;;  %s1416_s6 = scalar_lea.vmem [#allocation8], %s845_s24 }
  0x7b   : > { %305 = sbr.rel (%p847_p5) target bundleno = 130 (0x82), region = 40 }
  0x80   : > { %vm306_vm0 = vcmask 9216   ;;  %v1204_v0 = vmov 0.0  }
  0x81   : > { %307 = vst.msk [vmem:[%s1414_s29] sm:$0x3] %vm306_vm0, %v1204_v0  ;;  %308 = vst.msk [vmem:[%s1416_s6] sm:$0x3] %vm306_vm0, %v1204_v0 }
  0x82 PF: > { %v309_v1 = vld [vmem:[%s242_s4] sm:$0x3f]  ;;  %s848_s7 = sshll.u32 %s1188_s19, 1  ;;  %v315_v2 = vlaneseq  ;;  %v1205_v3 = vmov 0.0   ;;  %v1206_v4 = vmov 1983009808  }
  0x83   : > { %873 = vmatprep.subr.mxu1 %v1205_v3  ;;  %s312_s28 = sadd.s32 %s1184_s18, %s848_s7  ;;  %v326_v5 = vunpack.c.l.s4 %v1206_v4  ;;  %vm1207_vm1 = vmmov 0   ;;  %v310_v8 = vld [vmem:[%s251_s26] sm:$0x3f]  ;;  %v324_v10 = vcombine.high %v309_v1, %v309_v1  ;;  %s863_s18 = sshll.u32 %s1188_s19, 5  ;;  %vm511_vm5 = vcmask 9216  }
  0x84   : > { %s313_s21 = smul.u32 384, %s312_s28  ;;  %v316_v6 = vand.u32 127, %v315_v2  ;;  %v329_v7 = vshrl.u32 %v315_v2, 7  ;;  %875 = vmatprep.mubr.msk.f32.mxu1 %vm1207_vm1, %v1205_v3  ;;  %v347_v15 = vcombine.high %v310_v8, %v310_v8  ;;  %s675_s25 = sshll.u32 %s1414_s29, 4  ;;  %s1443_s25 = int_to_ptr.vmem [resolvable:$true] %s675_s25 }
  0x85   : > { %v327_v9 = vunpack.c.0.s8 %v326_v5  ;;  %s1441_s23 = scalar_lea.hbm %s1531_s2, %s863_s18  ;;  %s688_s4 = sshll.u32 %s1416_s6, 4  ;;  %s689_s4 = int_to_ptr.vmem [resolvable:$true] %s688_s4 }
  0x86   : > { %s314_s20 = ssub.s32 1024, %s313_s21  ;;  %v317_v11 = vadd.s32 128, %v316_v6  ;;  %v318_v12 = vadd.s32 256, %v316_v6  ;;  %s657_s10 = scalar_lea.sflag [#allocation4], %s1411_s30 }
  0x87   : > { %v319_v13 = vstv %s314_s20  ;;  %v330_v14 = vsub.s32 %v327_v9, %v329_v7  ;;  %s1046_s26 = scalar_lea.vmem %s1443_s25, 32  ;;  %s1208_s24 = smov [#allocation7]  }
  0x88   : > { %vm322_vm2 = vcmp.lt.s32.totalorder %v318_v12, %v319_v13  ;;  %vm321_vm3 = vcmp.lt.s32.totalorder %v317_v11, %v319_v13  ;;  %vm320_vm4 = vcmp.lt.s32.totalorder %v316_v6, %v319_v13  ;;  %v369_v24 = vld [vmem:[%s1414_s29] sm:$0x3]  ;;  %v513_v30 = vld [vmem:[%s1416_s6] sm:$0x3]  ;;  %p1047_p9 = scmp.ne.s32.totalorder %s1443_s25, %s1046_s26  ;;  %s1050_s7 = sshll.u32 %s1208_s24, 4  ;;  %s1051_s7 = int_to_ptr.vmem [resolvable:$false] %s1050_s7 }
  0x89   : > { %v331_v16 = vrot.slane %v309_v1, %v330_v14  ;;  %v338_v17 = vrot.slane %v324_v10, %v330_v14  ;;  %v354_v18 = vrot.slane %v310_v8, %v330_v14  ;;  %v361_v21 = vrot.slane %v347_v15, %v330_v14  ;;  %s1052_s28 = scalar_lea.vmem %s1051_s7, 64  ;;  %p1053_p4 = scmp.lt.s32.totalorder %s1443_s25, %s1051_s7 }
  0x8a   : > { %p1048_p0 = pnand %p1047_p9, %p1334_p2  ;;  %p1054_p6 = scmp.lt.s32.totalorder %s1052_s28, %s1046_s26 }
  0x8b   : > { %v339_v19 = vcombine.high %v331_v16, %v331_v16  ;;  %874 = vmatpush3.xpose.msk.msra.mxu1 %vm322_vm2, %v338_v17  ;;  %v362_v20 = vcombine.high %v354_v18, %v354_v18 }
  0x8c   : > { %878 = vmatprep.subr.mxu1 %v1205_v3  ;;  %p1049_p1 = pneg %p1048_p0  ;;  %p1055_p8 = por %p1054_p6, %p1053_p4 }
  0x8d   : > { %849 = vmatprep.subr.msk.mxu0 %vm321_vm3, %v339_v19  ;;  %851 = vmatprep.mubr.msk.f32.mxu0 %vm321_vm3, %v339_v19 }
  0x8e   : > { %850 = vmatpush1.xpose.msk.msra.mxu0 %vm320_vm4, %v331_v16  ;;  %876 = vmatmul.mubr.msk.f32.vlgmr.msra.gmra.mxu1 %vm322_vm2, %v338_v17  ;;  %p1056_p10 = pnand %p1055_p8, %p1049_p1 }
  0x8f   : > { %855 = vmatprep.subr.msk.mxu0 %vm321_vm3, %v362_v20  ;;  %879 = vmatpush3.xpose.msk.msra.mxu1 %vm322_vm2, %v361_v21 }
  0x90   : > { %880 = vmatprep.mubr.msk.f32.mxu1 %vm1207_vm1, %v1205_v3 }
  0x91   : > { %852 = vmatmul.mubr.msk.f32.vlgmr.msra.gmra.mxu0 %vm320_vm4, %v331_v16 }
  0x92   : > { %856 = vmatpush1.xpose.msk.msra.mxu0 %vm320_vm4, %v354_v18  ;;  %857 = vmatprep.mubr.msk.f32.mxu0 %vm321_vm3, %v362_v20 }
  0x93   : > { %881 = vmatmul.mubr.msk.f32.vlgmr.msra.gmra.mxu1 %vm322_vm2, %v361_v21 }
  0x95   : > { %858 = vmatmul.mubr.msk.f32.vlgmr.msra.gmra.mxu0 %vm320_vm4, %v354_v18 }
 0x14e   : > { %v506_v22 = vpop.f32.mrf.mxu1 }
 0x150   : > { %v877_v23 = vpop.f32.mrf.mxu1 }
 0x151   : > { %v436_v25 = vpop.f32.mrf.mxu0 }
 0x152   : > { %v507_v26 = vadd.f32 %v506_v22, %v436_v25 }
 0x153   : > { %v438_v27 = vpop.f32.mrf.mxu0  ;;  %v650_v28 = vpop.f32.mrf.mxu1 }
 0x154   : > { %v510_v29 = vadd.f32 %v507_v26, %v369_v24 }
 0x155   : > { %v580_v31 = vpop.f32.mrf.mxu0  ;;  %v882_v32 = vpop.f32.mrf.mxu1 }
 0x156   : > { %v651_v33 = vadd.f32 %v650_v28, %v580_v31  ;;  %512 = vst.msk [vmem:[%s1414_s29] sm:$0x3] %vm511_vm5, %v510_v29 }
 0x157   : > { %v582_v34 = vpop.f32.mrf.mxu0 }
 0x158   : > { %1059 = shalt.err (!%p1056_p10)
}
 0x159   : > { %s1060_s29 = scalar_lea.hbm %s1441_s23, 32  ;;  %s1064_s5 = scalar_lea.hbm %s1531_s2, 64 }
 0x15a   : > { %p1061_p11 = scmp.ne.s32.totalorder %s1441_s23, %s1060_s29  ;;  %p1065_p12 = scmp.lt.s32.totalorder %s1441_s23, %s1531_s2 }
 0x15b   : > { %p1066_p13 = scmp.lt.s32.totalorder %s1064_s5, %s1060_s29 }
 0x15c   : > { %p1062_p3 = pnand %p1061_p11, %p1334_p2 }
 0x15d   : > { %p1067_p5 = por %p1066_p13, %p1065_p12 }
 0x15e   : > { %p1063_p7 = pneg %p1062_p3 }
 0x160   : > { %p1068_p9 = pnand %p1067_p5, %p1063_p7 }
 0x162   : > { %1071 = shalt.err (!%p1068_p9)
}
 0x163   : > { %888 = dma.vmem_to_hbm [thread:$0]  (%p1334_p2), %s1443_s25, 32, %s1441_s23, %s657_s10   ;;  %v654_v35 = vadd.f32 %v651_v33, %v513_v30 }
 0x164   : > { %s686_s28 = scalar_lea.hbm %s1532_s3, %s863_s18  ;;  %s662_s29 = scalar_lea.sflag [#allocation9], %s1411_s30 }
 0x165   : > { %655 = vst.msk [vmem:[%s1416_s6] sm:$0x3] %vm511_vm5, %v654_v35  ;;  %s1072_s21 = scalar_lea.vmem %s689_s4, 32  ;;  %s1209_s20 = smov [#allocation8]  }
 0x166   : > { %p1073_p0 = scmp.ne.s32.totalorder %s689_s4, %s1072_s21  ;;  %s1076_s5 = sshll.u32 %s1209_s20, 4  ;;  %s1077_s5 = int_to_ptr.vmem [resolvable:$false] %s1076_s5 }
 0x167   : > { %s1078_s25 = scalar_lea.vmem %s1077_s5, 64  ;;  %p1079_p6 = scmp.lt.s32.totalorder %s689_s4, %s1077_s5 }
 0x168   : > { %p1074_p1 = pnand %p1073_p0, %p1334_p2  ;;  %p1080_p8 = scmp.lt.s32.totalorder %s1078_s25, %s1072_s21 }
 0x16a   : > { %p1075_p4 = pneg %p1074_p1  ;;  %p1081_p10 = por %p1080_p8, %p1079_p6 }
 0x16c   : > { %p1082_p11 = pnand %p1081_p10, %p1075_p4 }
 0x16e   : > { %1085 = shalt.err (!%p1082_p11)
}
 0x16f   : > { %s1086_s19 = scalar_lea.hbm %s686_s28, 32  ;;  %s1090_s18 = scalar_lea.hbm %s1532_s3, 64 }
 0x170   : > { %p1087_p3 = scmp.ne.s32.totalorder %s686_s28, %s1086_s19  ;;  %p1091_p13 = scmp.lt.s32.totalorder %s686_s28, %s1532_s3 }
 0x171   : > { %p1092_p5 = scmp.lt.s32.totalorder %s1090_s18, %s1086_s19 }
 0x172   : > { %p1088_p7 = pnand %p1087_p3, %p1334_p2 }
 0x173   : > { %p1093_p9 = por %p1092_p5, %p1091_p13 }
 0x174   : > { %p1089_p12 = pneg %p1088_p7 }
 0x176   : > { %p1094_p0 = pnand %p1093_p9, %p1089_p12 }
 0x178   : > { %1097 = shalt.err (!%p1094_p0)
}
 0x179   : > { %889 = dma.vmem_to_hbm [thread:$0]  (%p1334_p2), %s689_s4, 32, %s686_s28, %s662_s29  }
 0x17a PF: > { %p899_p1 = scmp.ge.s32.totalorder %s1200_s22, 2  ;;  %s700_s8 = sand.u32 1, %s1160_s12  }
 0x17b   : > { %p1545_p4 = scmp.ne.s32.totalorder %s1544_s27, 0  ;;  %s701_s24 = scalar_lea.sflag [#allocation4], %s700_s8 }
 0x17d   : > { %p893_p6 = pnand %p899_p1, %p1545_p4 }
 0x17f   : > { %p894_p8 = pneg %p893_p6 }
 0x181   : > { %1151 = dma.done.wait (%p894_p8), %s701_s24, 32  }
 0x182   : > { %1153 = vsyncadd (%p894_p8), %s701_s24, 4294967264  ;;  %s710_s26 = scalar_lea.sflag [#allocation9], %s700_s8 }
 0x183   : > { %1155 = dma.done.wait (%p894_p8), %s710_s26, 32  }
 0x184   : > { %1157 = vsyncadd (%p894_p8), %s710_s26, 4294967264  ;;  %s26_s22 = sadd.s32 1, %s1200_s22   ;;  %s1546_s18 = sld [smem:[#allocation14_spill]] }
 0x185   : > { %p23_p10 = scmp.ge.s32.totalorder %s26_s22, 6   ;;  %s1547_s19 = sld [smem:[#allocation15_spill]] }
 0x186   : > { %s1548_s20 = sld [smem:[#allocation16_spill]]  ;;  %s1550_s12 = smov %s1164_s13 }
 0x187   : > { %s1549_s21 = sld [smem:[#allocation17_spill]]  ;;  %s1551_s13 = smov %s1168_s14 }
 0x188   : > { %s1552_s14 = smov %s1320_s9  ;;  %s1553_s15 = smov %s1176_s16 }
 0x189   : > { %s1554_s16 = smov %s1180_s17  ;;  %s1555_s17 = smov %s1332_s11 }
 0x18a   :  { %25 = sbr.rel (!%p23_p10) target bundleno = 13 (0xd), region = 107 }
 0x18f   :  { %715 = vsyncpa [#allocation3], 1 }
 0x190   :  { %717 = vsyncpa [#allocation3 + $0x1], 1 }
 0x191   :  { %718 = vsyncpa [#allocation6], 1 }
 0x192   :  { %720 = vsyncpa [#allocation6 + $0x1], 1 }
 0x193   :  { %721 = vsyncpa [#allocation4], 1 }
 0x194   :  { %723 = vsyncpa [#allocation4 + $0x1], 1 }
 0x195   :  { %724 = vsyncpa [#allocation9], 1 }
 0x196   :  { %726 = vsyncpa [#allocation9 + $0x1], 1 }

</bundles_post_ra>
